<compile_context>
chip_gen: v6e
topology: v6e:2x2x1
jax: 0.10.0
libtpu: 0.0.40
codegen_flags: <defaults>
</compile_context>

<pallas_src>
import math

import jax
import jax.numpy as jnp
from jax.experimental import pallas as pl
from jax.experimental.pallas import tpu as pltpu


# ----------------------------- Kernel 1: projections -------------------------

def _proj_kernel(q_ref, k_ref, wq_ref, wk_ref, bias_ref, pq_ref, pk_ref):
    """pq = q @ Wq^T + normalize_bias ; pk = k @ Wk^T  (batch folded into M)."""
    pq = jnp.dot(q_ref[...].astype(jnp.bfloat16), wq_ref[...],
                 preferred_element_type=jnp.float32)            # (Mq, n), f32 acc
    pq_ref[...] = pq + bias_ref[...]                            # bias folded once
    pk_ref[...] = jnp.dot(k_ref[...].astype(jnp.bfloat16), wk_ref[...],
                          preferred_element_type=jnp.float32)   # (Mk, n)


# ------------------------ Kernel 2: score + softmax + ctx ---------------------

def _attn_kernel(v_ref, pq_ref, pk_ref, k_ref, ctx_ref):
    b_t, t_q, n = pq_ref.shape
    t_k = pk_ref.shape[1]

    # Chunk num_units into 128-lane slices: the live (b_t, t_q, t_k, n_chunk)
    # tanh intermediate stays bounded instead of scaling with n (v7x VMEM).
    n_chunk = 128 if n % 128 == 0 else n
    num_chunks = n // n_chunk

    scores = jnp.zeros((b_t, t_q, t_k), jnp.float32)
    for c in range(num_chunks):                     # static unroll, static offsets
        sl = slice(c * n_chunk, (c + 1) * n_chunk)
        pq_c = pq_ref[:, :, sl]                     # (b_t, t_q, nc), bias already in
        pk_c = pk_ref[:, :, sl]                     # (b_t, t_k, nc)
        v_c = v_ref[:, sl]                          # (1, nc) normalized/scaled att vec
        t = jnp.tanh(pq_c[:, :, None, :] + pk_c[:, None, :, :])   # (b_t,t_q,t_k,nc)
        scores = scores + jnp.sum(t * v_c, axis=-1)

    # softmax over t_k.
    # TODO(synk): optional set_mask()/masked_fill path not implemented; the
    # module's default forward runs with self.mask = None.
    m = jnp.max(scores, axis=-1, keepdims=True)
    e = jnp.exp(scores - m)
    l = jnp.sum(e, axis=-1, keepdims=True)
    p = e * pl.reciprocal(l, approx=True)           # EUP rcp + VALU mul, no divide

    # context = softmax(scores) @ raw keys — bf16 MXU inputs, f32 accumulation.
    ctx = jnp.einsum("bqk,bkd->bqd",
                     p.astype(jnp.bfloat16),
                     k_ref[...].astype(jnp.bfloat16),
                     preferred_element_type=jnp.float32)
    ctx_ref[...] = ctx.astype(ctx_ref.dtype)


# --------------------------------- wrappers -----------------------------------

def _pick_b_tile(b, t_q, t_k, n, budget_bytes=8 * 1024 * 1024):
    """Batch elements per grid step: big enough to amortize per-step pipeline
    overhead, small enough that the live tanh intermediate fits comfortably in
    VMEM, and leaving >=2 grid steps so the 'parallel' axis can shard across
    two TensorCores (v7x megacore)."""
    n_chunk = 128 if n % 128 == 0 else n
    per_batch = t_q * t_k * n_chunk * 4
    bt = max(1, min(b, budget_bytes // max(per_batch, 1)))
    while b % bt:
        bt -= 1
    if b >= 2 and (b // bt) < 2:
        bt = max(1, bt // 2)
        while b % bt:
            bt -= 1
    return bt


def bahdanau_attention_pallas(query_bf, keys_bf, wq, wk, linear_att,
                              normalize_scalar, normalize_bias):
    """query_bf: (b, t_q, Dq), keys_bf: (b, t_k, Dk). Returns context (b, t_q, Dk)."""
    b, t_q, dq = query_bf.shape
    _, t_k, dk = keys_bf.shape
    n = wq.shape[0]  # num_units

    # One-time parameter glue: pre-transposed bf16 weights for the MXU,
    # normalized & scaled attention vector, bias as a (1, n) row.
    wq_t = wq.T.astype(jnp.bfloat16)
    wk_t = wk.T.astype(jnp.bfloat16)
    bias = normalize_bias.reshape(1, n).astype(jnp.float32)
    v_eff = (linear_att / jnp.linalg.norm(linear_att)) * normalize_scalar
    v_eff = v_eff.reshape(1, n).astype(jnp.float32)

    # ---- Kernel 1: projections, batch folded into M (single batched matmul) ----
    q2d = query_bf.reshape(b * t_q, dq)
    k2d = keys_bf.reshape(b * t_k, dk)
    pq2d, pk2d = pl.pallas_call(
        _proj_kernel,
        grid_spec=pltpu.PrefetchScalarGridSpec(
            num_scalar_prefetch=0,
            grid=(1,),
            in_specs=[
                pl.BlockSpec((b * t_q, dq), lambda i: (0, 0)),
                pl.BlockSpec((b * t_k, dk), lambda i: (0, 0)),
                pl.BlockSpec((dq, n), lambda i: (0, 0)),
                pl.BlockSpec((dk, n), lambda i: (0, 0)),
                pl.BlockSpec((1, n), lambda i: (0, 0)),
            ],
            out_specs=[
                pl.BlockSpec((b * t_q, n), lambda i: (0, 0)),
                pl.BlockSpec((b * t_k, n), lambda i: (0, 0)),
            ],
        ),
        out_shape=(
            jax.ShapeDtypeStruct((b * t_q, n), jnp.float32),
            jax.ShapeDtypeStruct((b * t_k, n), jnp.float32),
        ),
        compiler_params=pltpu.CompilerParams(
            dimension_semantics=("arbitrary",)),
    )(q2d, k2d, wq_t, wk_t, bias)

    pq = pq2d.reshape(b, t_q, n)
    pk = pk2d.reshape(b, t_k, n)

    # ---- Kernel 2: score + softmax + context, B_TILE batches per grid step ----
    b_tile = _pick_b_tile(b, t_q, t_k, n)
    grid = (b // b_tile,)
    ctx = pl.pallas_call(
        _attn_kernel,
        grid_spec=pltpu.PrefetchScalarGridSpec(
            num_scalar_prefetch=0,
            grid=grid,
            in_specs=[
                pl.BlockSpec((1, n), lambda i: (0, 0)),
                pl.BlockSpec((b_tile, t_q, n), lambda i: (i, 0, 0)),
                pl.BlockSpec((b_tile, t_k, n), lambda i: (i, 0, 0)),
                pl.BlockSpec((b_tile, t_k, dk), lambda i: (i, 0, 0)),
            ],
            out_specs=pl.BlockSpec((b_tile, t_q, dk), lambda i: (i, 0, 0)),
        ),
        out_shape=jax.ShapeDtypeStruct((b, t_q, dk), jnp.float32),
        compiler_params=pltpu.CompilerParams(
            dimension_semantics=("parallel",),
            vmem_limit_bytes=32 * 1024 * 1024),
    )(v_eff, pq, pk, keys_bf)
    return ctx


def attention_forward(query, keys, params):
    """Mirrors Attention_.forward with batch_first=False, 3-D query, mask=None.

    query: (t_q, b, Dq), keys: (t_k, b, Dk)
    returns (query0, context, concat(query0, context, axis=2))
    """
    query0 = query
    query_bf = jnp.transpose(query, (1, 0, 2))   # (b, t_q, Dq)
    keys_bf = jnp.transpose(keys, (1, 0, 2))     # (b, t_k, Dk)

    ctx_bf = bahdanau_attention_pallas(
        query_bf, keys_bf,
        params["wq"], params["wk"], params["linear_att"],
        params["normalize_scalar"], params["normalize_bias"])

    context = jnp.transpose(ctx_bf, (1, 0, 2))   # (t_q, b, Dk)
    return query0, context, jnp.concatenate((query0, context), axis=2)


def _reference_forward(query, keys, params):
    """Pure-JAX f32 reference of the PyTorch forward (sanity check)."""
    q = jnp.transpose(query, (1, 0, 2))
    k = jnp.transpose(keys, (1, 0, 2))
    pq = q @ params["wq"].T
    pk = k @ params["wk"].T
    v = params["linear_att"]
    v = (v / jnp.linalg.norm(v)) * params["normalize_scalar"]
    s = pq[:, :, None, :] + pk[:, None, :, :] + params["normalize_bias"]
    scores = jnp.tanh(s) @ v
    p = jax.nn.softmax(scores, axis=-1)
    ctx = jnp.einsum("bqk,bkd->bqd", p, k)
    ctx = jnp.transpose(ctx, (1, 0, 2))
    return query, ctx, jnp.concatenate((query, ctx), axis=2)


if __name__ == "__main__":
    # Small but lane-dense shapes (n = dk = 128), seq-first layout like the module.
    t_q, t_k, b = 8, 16, 4
    query_size = key_size = num_units = 128
    init_weight = 0.1

    key = jax.random.PRNGKey(0)
    k1, k2, k3, k4, k5 = jax.random.split(key, 5)

    params = {
        "wq": jax.random.uniform(k1, (num_units, query_size), jnp.float32,
                                 -init_weight, init_weight),
        "wk": jax.random.uniform(k2, (num_units, key_size), jnp.float32,
                                 -init_weight, init_weight),
        "linear_att": jax.random.uniform(k3, (num_units,), jnp.float32,
                                         -init_weight, init_weight),
        "normalize_scalar": jnp.float32(1.0 / math.sqrt(num_units)),
        "normalize_bias": jnp.zeros((num_units,), jnp.float32),
    }

    query = jax.random.normal(k4, (t_q, b, query_size), jnp.float32)
    keys = jax.random.normal(k5, (t_k, b, key_size), jnp.float32)

    q0, ctx, cat = attention_forward(query, keys, params)
    jax.block_until_ready((q0, ctx, cat))

    # Sanity check against the f32 reference.  Tolerance accounts for bf16 MXU
    # inputs (f32 accumulation) and the approx softmax reciprocal.
    q0_r, ctx_r, cat_r = _reference_forward(query, keys, params)
    assert jnp.allclose(ctx, ctx_r, atol=2e-2, rtol=2e-2), "context mismatch"
    assert jnp.allclose(cat, cat_r, atol=2e-2, rtol=2e-2), "concat mismatch"

    print("KERNEL_OK")
</pallas_src>

<mosaic_0001>
module attributes {stable_mosaic.version = 11 : i64} {
  func.func @_proj_kernel(%arg0: i32, %arg1: memref<32x128xf32, #tpu.memory_space<vmem>>, %arg2: memref<64x128xf32, #tpu.memory_space<vmem>>, %arg3: memref<128x128xbf16, #tpu.memory_space<vmem>>, %arg4: memref<128x128xbf16, #tpu.memory_space<vmem>>, %arg5: memref<1x128xf32, #tpu.memory_space<vmem>>, %arg6: memref<32x128xf32, #tpu.memory_space<vmem>>, %arg7: memref<64x128xf32, #tpu.memory_space<vmem>>) attributes {dimension_semantics = [#tpu.dimension_semantics<arbitrary>], iteration_bounds = array<i64: 1>, scalar_prefetch = 0 : i64, scratch_operands = 0 : i64, tpu.core_type = #tpu.core_type<tc>, window_params = [{pipeline_mode = #tpu.pipeline_mode<synchronous>, transform_indices = @transform_0, window_bounds = array<i64: 32, 128>}, {pipeline_mode = #tpu.pipeline_mode<synchronous>, transform_indices = @transform_1, window_bounds = array<i64: 64, 128>}, {pipeline_mode = #tpu.pipeline_mode<synchronous>, transform_indices = @transform_2, window_bounds = array<i64: 128, 128>}, {pipeline_mode = #tpu.pipeline_mode<synchronous>, transform_indices = @transform_3, window_bounds = array<i64: 128, 128>}, {pipeline_mode = #tpu.pipeline_mode<synchronous>, transform_indices = @transform_4, window_bounds = array<i64: 1, 128>}, {pipeline_mode = #tpu.pipeline_mode<synchronous>, transform_indices = @transform_5, window_bounds = array<i64: 32, 128>}, {pipeline_mode = #tpu.pipeline_mode<synchronous>, transform_indices = @transform_6, window_bounds = array<i64: 64, 128>}]} {
    %c0 = arith.constant 0 : index
    %c0_0 = arith.constant 0 : index
    %0 = vector.load %arg1[%c0, %c0_0] : memref<32x128xf32, #tpu.memory_space<vmem>>, vector<32x128xf32>
    %1 = arith.truncf %0 : vector<32x128xf32> to vector<32x128xbf16>
    %c0_1 = arith.constant 0 : index
    %c0_2 = arith.constant 0 : index
    %2 = vector.load %arg3[%c0_1, %c0_2] : memref<128x128xbf16, #tpu.memory_space<vmem>>, vector<128x128xbf16>
    %cst = arith.constant dense<0.000000e+00> : vector<32x128xf32>
    %3 = tpu.matmul %1, %2, %cst {dimension_numbers = #tpu.dot_dimension_numbers<[1], [0], [0], [1], [0, 0, 1, 1], [], []>} : vector<32x128xbf16>, vector<128x128xbf16>, vector<32x128xf32> -> vector<32x128xf32>
    %c0_3 = arith.constant 0 : index
    %c0_4 = arith.constant 0 : index
    %4 = vector.load %arg5[%c0_3, %c0_4] : memref<1x128xf32, #tpu.memory_space<vmem>>, vector<1x128xf32>
    %5 = vector.broadcast %4 : vector<1x128xf32> to vector<32x128xf32>
    %6 = arith.addf %3, %5 : vector<32x128xf32>
    %c0_5 = arith.constant 0 : index
    %c0_6 = arith.constant 0 : index
    %7 = vector.load %arg6[%c0_5, %c0_6] : memref<32x128xf32, #tpu.memory_space<vmem>>, vector<32x128xf32>
    tpu.vector_store %arg6[%c0_5, %c0_6], %6 {strides = array<i32>} : memref<32x128xf32, #tpu.memory_space<vmem>>, vector<32x128xf32>,
    %c0_7 = arith.constant 0 : index
    %c0_8 = arith.constant 0 : index
    %8 = vector.load %arg2[%c0_7, %c0_8] : memref<64x128xf32, #tpu.memory_space<vmem>>, vector<64x128xf32>
    %9 = arith.truncf %8 : vector<64x128xf32> to vector<64x128xbf16>
    %c0_9 = arith.constant 0 : index
    %c0_10 = arith.constant 0 : index
    %10 = vector.load %arg4[%c0_9, %c0_10] : memref<128x128xbf16, #tpu.memory_space<vmem>>, vector<128x128xbf16>
    %cst_11 = arith.constant dense<0.000000e+00> : vector<64x128xf32>
    %11 = tpu.matmul %9, %10, %cst_11 {dimension_numbers = #tpu.dot_dimension_numbers<[1], [0], [0], [1], [0, 0, 1, 1], [], []>} : vector<64x128xbf16>, vector<128x128xbf16>, vector<64x128xf32> -> vector<64x128xf32>
    %c0_12 = arith.constant 0 : index
    %c0_13 = arith.constant 0 : index
    %12 = vector.load %arg7[%c0_12, %c0_13] : memref<64x128xf32, #tpu.memory_space<vmem>>, vector<64x128xf32>
    tpu.vector_store %arg7[%c0_12, %c0_13], %11 {strides = array<i32>} : memref<64x128xf32, #tpu.memory_space<vmem>>, vector<64x128xf32>,
    return
  }
  func.func @transform_0(%arg0: i32) -> (i32, i32) {
    %c0_i32 = arith.constant 0 : i32
    %c0_i32_0 = arith.constant 0 : i32
    %c0_i32_1 = arith.constant 0 : i32
    return %c0_i32, %c0_i32_0 : i32, i32
  }
  func.func @transform_1(%arg0: i32) -> (i32, i32) {
    %c0_i32 = arith.constant 0 : i32
    %c0_i32_0 = arith.constant 0 : i32
    %c0_i32_1 = arith.constant 0 : i32
    return %c0_i32, %c0_i32_0 : i32, i32
  }
  func.func @transform_2(%arg0: i32) -> (i32, i32) {
    %c0_i32 = arith.constant 0 : i32
    %c0_i32_0 = arith.constant 0 : i32
    %c0_i32_1 = arith.constant 0 : i32
    return %c0_i32, %c0_i32_0 : i32, i32
  }
  func.func @transform_3(%arg0: i32) -> (i32, i32) {
    %c0_i32 = arith.constant 0 : i32
    %c0_i32_0 = arith.constant 0 : i32
    %c0_i32_1 = arith.constant 0 : i32
    return %c0_i32, %c0_i32_0 : i32, i32
  }
  func.func @transform_4(%arg0: i32) -> (i32, i32) {
    %c0_i32 = arith.constant 0 : i32
    %c0_i32_0 = arith.constant 0 : i32
    %c0_i32_1 = arith.constant 0 : i32
    return %c0_i32, %c0_i32_0 : i32, i32
  }
  func.func @transform_5(%arg0: i32) -> (i32, i32) {
    %c0_i32 = arith.constant 0 : i32
    %c0_i32_0 = arith.constant 0 : i32
    %c0_i32_1 = arith.constant 0 : i32
    return %c0_i32, %c0_i32_0 : i32, i32
  }
  func.func @transform_6(%arg0: i32) -> (i32, i32) {
    %c0_i32 = arith.constant 0 : i32
    %c0_i32_0 = arith.constant 0 : i32
    %c0_i32_1 = arith.constant 0 : i32
    return %c0_i32, %c0_i32_0 : i32, i32
  }
}

</mosaic_0001>

<bundles_post_ra>
// kernel: tpu_custom_call.1
= control target key start
LH: loop header
LB: loop body
LE: loop exit
PB: predicated region body
PF: predicated region fallthrough
CT: control target
= control target key end

     0   :  { %12 = vsyncpa [#allocation3], 0  ;;  %s711_s0 = inlined_call_operand.hbm [shape: f32[32,128], index: 0, kind: input, shape index: {}]   ;;  %s712_s1 = inlined_call_operand.hbm [shape: f32[64,128], index: 1, kind: input, shape index: {}]   ;;  %s713_s2 = inlined_call_operand.hbm [shape: bf16[128,128], index: 2, kind: input, shape index: {}]   ;;  %s714_s3 = inlined_call_operand.hbm [shape: bf16[128,128], index: 3, kind: input, shape index: {}]   ;;  %s715_s4 = inlined_call_operand.vmem [shape: f32[1,128], index: 4, kind: input, shape index: {}]   ;;  %s716_s5 = inlined_call_operand.hbm [shape: f32[32,128], index: 5, kind: output, shape index: {0}]   ;;  %s717_s6 = inlined_call_operand.hbm [shape: f32[64,128], index: 6, kind: output, shape index: {1}]  }
   0x1   :  { %13 = vsyncpa [#allocation6], 0 }
   0x2   :  { %14 = vsyncpa [#allocation9], 0 }
   0x3   :  { %15 = vsyncpa [#allocation4], 0 }
   0x4   :  { %16 = vsyncpa [#allocation12], 0  ;;  %s633_s21 = smov [#allocation5]   ;;  %s634_s23 = smov [#allocation2]  }
   0x5   :  { %s34_s22 = sshll.u32 %s633_s21, 4  ;;  %s22_s24 = sshll.u32 %s634_s23, 4  ;;  %s35_s22 = int_to_ptr.vmem [resolvable:$true] %s34_s22  ;;  %s23_s24 = int_to_ptr.vmem [resolvable:$true] %s22_s24 }
   0x6   :  { %s511_s25 = scalar_lea.vmem %s35_s22, 1024  ;;  %p516_p1 = scmp.lt.s32.totalorder %s35_s22, %s35_s22 }
   0x7   :  { %p512_p0 = scmp.ne.s32.totalorder %s35_s22, %s511_s25  ;;  %p517_p2 = scmp.lt.s32.totalorder %s511_s25, %s511_s25 }
   0x9   :  { %p518_p3 = por %p517_p2, %p516_p1 }
   0xb   :  { %p519_p4 = pnand %p518_p3, %p512_p0 }
   0xd   :  { %522 = shalt.err (!%p519_p4)
}
   0xe   :  { %s635_s26 = smov 128   ;;  %s636_s27 = smov 8  }
   0xf   :  { %40 = dma.hbm_to_vmem [thread:$0]  %s712_s1, 1024, %s35_s22, [#allocation6], %s635_s26, %s635_s26, %s636_s27  }
  0x10   :  { %s531_s30 = scalar_lea.vmem %s23_s24, 512  ;;  %p536_p6 = scmp.lt.s32.totalorder %s23_s24, %s23_s24 }
  0x11   :  { %p532_p5 = scmp.ne.s32.totalorder %s23_s24, %s531_s30  ;;  %p537_p7 = scmp.lt.s32.totalorder %s531_s30, %s531_s30 }
  0x13   :  { %p538_p8 = por %p537_p7, %p536_p6 }
  0x15   :  { %p539_p9 = pnand %p538_p8, %p532_p5 }
  0x17   :  { %542 = shalt.err (!%p539_p9)
}
  0x18   :  { %28 = dma.hbm_to_vmem [thread:$0]  %s711_s0, 512, %s23_s24, [#allocation3], %s635_s26, %s635_s26, %s636_s27  }
  0x19   :  { %s637_s9 = smov [#allocation7]  }
  0x1a   :  { %s46_s10 = sshll.u32 %s637_s9, 4  ;;  %s47_s10 = int_to_ptr.vmem [resolvable:$true] %s46_s10 }
  0x1b   :  { %s551_s11 = scalar_lea.vmem %s47_s10, 1024  ;;  %p556_p11 = scmp.lt.s32.totalorder %s47_s10, %s47_s10 }
  0x1c   :  { %p552_p10 = scmp.ne.s32.totalorder %s47_s10, %s551_s11  ;;  %p557_p12 = scmp.lt.s32.totalorder %s551_s11, %s551_s11 }
  0x1e   :  { %p558_p13 = por %p557_p12, %p556_p11 }
  0x20   :  { %p559_p0 = pnand %p558_p13, %p552_p10 }
  0x22   :  { %562 = shalt.err (!%p559_p0)
}
  0x23   :  { %s638_s1 = smov 64   ;;  %s639_s12 = smov 4  }
  0x24   :  { %52 = dma.hbm_to_vmem [thread:$0]  %s713_s2, 1024, %s47_s10, [#allocation6], %s638_s1, %s638_s1, %s639_s12  }
  0x25   :  { %s640_s15 = smov [#allocation8]  }
  0x26   :  { %s58_s16 = sshll.u32 %s640_s15, 4  ;;  %s59_s16 = int_to_ptr.vmem [resolvable:$true] %s58_s16 }
  0x27   :  { %s571_s0 = scalar_lea.vmem %s59_s16, 1024  ;;  %p576_p2 = scmp.lt.s32.totalorder %s59_s16, %s59_s16 }
  0x28   :  { %p572_p1 = scmp.ne.s32.totalorder %s59_s16, %s571_s0  ;;  %p577_p3 = scmp.lt.s32.totalorder %s571_s0, %s571_s0 }
  0x2a   :  { %p578_p4 = por %p577_p3, %p576_p2 }
  0x2c   :  { %p579_p5 = pnand %p578_p4, %p572_p1 }
  0x2e   :  { %582 = shalt.err (!%p579_p5)
}
  0x2f   :  { %64 = dma.hbm_to_vmem [thread:$0]  %s714_s3, 1024, %s59_s16, [#allocation9], %s638_s1, %s638_s1, %s639_s12  }
  0x30   :  { %623 = dma.done.wait [#allocation3], 512  }
  0x31   :  { %624 = vsyncadd [#allocation3], 4294966784 }
  0x32   :  { %625 = dma.done.wait [#allocation6], 2048  }
  0x33   :  { %626 = vsyncadd [#allocation6], 4294965248 }
  0x34   :  { %627 = dma.done.wait [#allocation9], 1024  }
  0x35   :  { %628 = vsyncadd [#allocation9], 4294966272  ;;  %v487_v0 = vld [vmem:[#allocation7 + $0x38] sm:$0xff]   ;;  %v489_v2 = vld [vmem:[#allocation7 + $0x30] sm:$0xff]   ;;  %s641_s19 = smov [#allocation10]  }
  0x36   :  { %v488_v1 = vld [vmem:[#allocation8 + $0x38] sm:$0xff]   ;;  %433 = vmatprep.subr.bf16.mxu0 %v487_v0  ;;  %v490_v3 = vld [vmem:[#allocation8 + $0x30] sm:$0xff]   ;;  %v491_v4 = vld [vmem:[#allocation7 + $0x28] sm:$0xff]   ;;  %s364_s20 = sshll.u32 %s641_s19, 4  ;;  %s365_s20 = int_to_ptr.vmem [resolvable:$true] %s364_s20 }
  0x37   :  { %453 = vmatprep.subr.bf16.mxu1 %v488_v1  ;;  %434 = vmatpush3.bf16.msra.mxu0 %v487_v0  ;;  %v492_v5 = vld [vmem:[#allocation8 + $0x28] sm:$0xff]   ;;  %v493_v6 = vld [vmem:[#allocation7 + $0x20] sm:$0xff]   ;;  %v495_v8 = vld [vmem:[#allocation7 + $0x18] sm:$0xff]   ;;  %p588_p7 = scmp.lt.s32.totalorder %s365_s20, %s365_s20 }
  0x38   :  { %454 = vmatpush3.bf16.msra.mxu1 %v488_v1  ;;  %435 = vmatprep.subr.bf16.mxu0 %v489_v2  ;;  %v494_v7 = vld [vmem:[#allocation8 + $0x20] sm:$0xff]   ;;  %v496_v9 = vld [vmem:[#allocation8 + $0x18] sm:$0xff]   ;;  %v497_v10 = vld [vmem:[#allocation7 + $0x10] sm:$0xff]  }
  0x39   :  { %455 = vmatprep.subr.bf16.mxu1 %v490_v3  ;;  %v80_v11 = vld [vmem:[#allocation2] sm:$0xff]  ;;  %v81_v12 = vld [vmem:[#allocation2 + $0x8] sm:$0xff]  ;;  %v498_v14 = vld [vmem:[#allocation8 + $0x10] sm:$0xff]  }
  0x3a   :  { %v210_v13 = vld [vmem:[#allocation5] sm:$0xff]  ;;  %v84_v15 = vpack.c.bf16 %v81_v12, %v80_v11  ;;  %v211_v16 = vld [vmem:[#allocation5 + $0x8] sm:$0xff]  ;;  %v82_v22 = vld [vmem:[#allocation2 + $0x10] sm:$0xff] }
  0x3b   :  { %436 = vmatpush3.bf16.msra.mxu0 %v489_v2  ;;  %v218_v17 = vpack.c.bf16 %v211_v16, %v210_v13  ;;  %v499_v18 = vld [vmem:[#allocation7 + $0x8] sm:$0xff]   ;;  %v501_v20 = vld [vmem:[#allocation7] sm:$0xff]   ;;  %v83_v23 = vld [vmem:[#allocation2 + $0x18] sm:$0xff] }
  0x3c   :  { %456 = vmatpush3.bf16.msra.mxu1 %v490_v3  ;;  %437 = vmatprep.subr.bf16.mxu0 %v491_v4  ;;  %v500_v19 = vld [vmem:[#allocation8 + $0x8] sm:$0xff]   ;;  %v502_v21 = vld [vmem:[#allocation8] sm:$0xff]   ;;  %v212_v24 = vld [vmem:[#allocation5 + $0x10] sm:$0xff]  ;;  %v85_v28 = vpack.c.bf16 %v83_v23, %v82_v22 }
  0x3d   :  { %457 = vmatprep.subr.bf16.mxu1 %v492_v5  ;;  %449 = vmatprep.mubr.bf16.mxu0 %v84_v15  ;;  %v213_v25 = vld [vmem:[#allocation5 + $0x18] sm:$0xff]  ;;  %v214_v26 = vld [vmem:[#allocation5 + $0x20] sm:$0xff]  ;;  %v215_v27 = vld [vmem:[#allocation5 + $0x28] sm:$0xff] }
  0x3e   :  { %469 = vmatprep.mubr.bf16.mxu1 %v218_v17  ;;  %v219_v29 = vpack.c.bf16 %v213_v25, %v212_v24  ;;  %v220_v30 = vpack.c.bf16 %v215_v27, %v214_v26  ;;  %v216_v31 = vld [vmem:[#allocation5 + $0x30] sm:$0xff]  ;;  %v217_v32 = vld [vmem:[#allocation5 + $0x38] sm:$0xff]  ;;  %v394_v34 = vld [vmem:[%s715_s4] ss:$0 sm:$0xff]  ;;  %s583_s4 = scalar_lea.vmem %s365_s20, 512 }
  0x3f   :  { %438 = vmatpush3.bf16.msra.mxu0 %v491_v4  ;;  %v221_v33 = vpack.c.bf16 %v217_v32, %v216_v31  ;;  %p584_p6 = scmp.ne.s32.totalorder %s365_s20, %s583_s4  ;;  %p589_p8 = scmp.lt.s32.totalorder %s583_s4, %s583_s4 }
  0x40   :  { %458 = vmatpush3.bf16.msra.mxu1 %v492_v5  ;;  %439 = vmatprep.subr.bf16.mxu0 %v493_v6 }
  0x41   :  { %459 = vmatprep.subr.bf16.mxu1 %v494_v7  ;;  %p590_p9 = por %p589_p8, %p588_p7 }
  0x43   :  { %440 = vmatpush3.bf16.msra.mxu0 %v493_v6  ;;  %p591_p10 = pnand %p590_p9, %p584_p6 }
  0x44   :  { %460 = vmatpush3.bf16.msra.mxu1 %v494_v7  ;;  %441 = vmatprep.subr.bf16.mxu0 %v495_v8 }
  0x45   :  { %461 = vmatprep.subr.bf16.mxu1 %v496_v9 }
  0x47   :  { %442 = vmatpush3.bf16.msra.mxu0 %v495_v8 }
  0x48   :  { %462 = vmatpush3.bf16.msra.mxu1 %v496_v9  ;;  %443 = vmatprep.subr.bf16.mxu0 %v497_v10 }
  0x49   :  { %463 = vmatprep.subr.bf16.mxu1 %v498_v14 }
  0x4b   :  { %444 = vmatpush3.bf16.msra.mxu0 %v497_v10 }
  0x4c   :  { %464 = vmatpush3.bf16.msra.mxu1 %v498_v14  ;;  %445 = vmatprep.subr.bf16.mxu0 %v499_v18 }
  0x4d   :  { %465 = vmatprep.subr.bf16.mxu1 %v500_v19 }
  0x4f   :  { %446 = vmatpush3.bf16.msra.mxu0 %v499_v18 }
  0x50   :  { %466 = vmatpush3.bf16.msra.mxu1 %v500_v19  ;;  %447 = vmatprep.subr.bf16.mxu0 %v501_v20 }
  0x51   :  { %467 = vmatprep.subr.bf16.mxu1 %v502_v21 }
  0x53   :  { %448 = vmatpush3.bf16.msra.mxu0 %v501_v20 }
  0x54   :  { %468 = vmatpush3.bf16.msra.mxu1 %v502_v21 }
  0x56   :  { %450 = vmatmul.mubr.bf16.vlgmr.msra.gmra.mxu0 %v85_v28 }
  0x57   :  { %470 = vmatmul.mubr.bf16.vlgmr.msra.gmra.mxu1 %v219_v29 }
  0x58   :  { %473 = vmatprep.mubr.bf16.mxu1 %v220_v30 }
  0x5f   :  { %474 = vmatmul.mubr.bf16.gmra.mxu1 %v221_v33 }
 0x116   :  { %v451_v35 = vpop.f32.mrf.mxu0 }
 0x117   :  { %v200_v36 = vadd.f32 %v451_v35, %v394_v34  ;;  %v471_v37 = vpop.f32.mrf.mxu1 }
 0x118   :  { %353 = vst [vmem:[#allocation11 + $0x10] sm:$0xff] %v471_v37  ;;  %v191_v38 = vpop.f32.mrf.mxu0 }
 0x119   :  { %208 = vst [vmem:[#allocation10 + $0x10] sm:$0xff] %v200_v36  ;;  %v192_v39 = vadd.f32 %v394_v34, %v191_v38  ;;  %v320_v40 = vpop.f32.mrf.mxu1 }
 0x11a   :  { %351 = vst [vmem:[#allocation11] sm:$0xff] %v320_v40  ;;  %v452_v41 = vpop.f32.mrf.mxu0 }
 0x11b   :  { %206 = vst [vmem:[#allocation10] sm:$0xff] %v192_v39  ;;  %v203_v42 = vadd.f32 %v452_v41, %v394_v34  ;;  %v472_v43 = vpop.f32.mrf.mxu1 }
 0x11c   :  { %354 = vst [vmem:[#allocation11 + $0x18] sm:$0xff] %v472_v43  ;;  %v194_v44 = vpop.f32.mrf.mxu0 }
 0x11d   :  { %209 = vst [vmem:[#allocation10 + $0x18] sm:$0xff] %v203_v42  ;;  %v195_v45 = vadd.f32 %v394_v34, %v194_v44  ;;  %v323_v46 = vpop.f32.mrf.mxu1 }
 0x11e   :  { %352 = vst [vmem:[#allocation11 + $0x8] sm:$0xff] %v323_v46 }
 0x11f   :  { %207 = vst [vmem:[#allocation10 + $0x8] sm:$0xff] %v195_v45  ;;  %v475_v47 = vpop.f32.mrf.mxu1 }
 0x120   :  { %357 = vst [vmem:[#allocation11 + $0x30] sm:$0xff] %v475_v47 }
 0x121   :  { %594 = shalt.err (!%p591_p10)
}
 0x122   :  { %370 = dma.vmem_to_hbm [thread:$0]  %s365_s20, 512, %s716_s5, [#allocation4], %s635_s26, %s635_s26, %s636_s27   ;;  %v336_v48 = vpop.f32.mrf.mxu1 }
 0x123   :  { %s642_s23 = smov [#allocation11]   ;;  %355 = vst [vmem:[#allocation11 + $0x20] sm:$0xff] %v336_v48 }
 0x124   :  { %s376_s24 = sshll.u32 %s642_s23, 4  ;;  %v476_v49 = vpop.f32.mrf.mxu1  ;;  %s377_s24 = int_to_ptr.vmem [resolvable:$true] %s376_s24 }
 0x125   :  { %358 = vst [vmem:[#allocation11 + $0x38] sm:$0xff] %v476_v49  ;;  %s603_s25 = scalar_lea.vmem %s377_s24, 1024  ;;  %p608_p12 = scmp.lt.s32.totalorder %s377_s24, %s377_s24 }
 0x126   :  { %v339_v50 = vpop.f32.mrf.mxu1  ;;  %p604_p11 = scmp.ne.s32.totalorder %s377_s24, %s603_s25  ;;  %p609_p13 = scmp.lt.s32.totalorder %s603_s25, %s603_s25 }
 0x127   :  { %356 = vst [vmem:[#allocation11 + $0x28] sm:$0xff] %v339_v50 }
 0x128   :  { %p610_p0 = por %p609_p13, %p608_p12 }
 0x12a   :  { %p611_p1 = pnand %p610_p0, %p604_p11 }
 0x12c   :  { %614 = shalt.err (!%p611_p1)
}
 0x12d   :  { %382 = dma.vmem_to_hbm [thread:$0]  %s377_s24, 1024, %s717_s6, [#allocation12], %s635_s26, %s635_s26, %s636_s27  }
 0x12e   :  { %629 = dma.done.wait [#allocation4], 512  }
 0x12f   :  { %630 = vsyncadd [#allocation4], 4294966784 }
 0x130   :  { %631 = dma.done.wait [#allocation12], 1024  }
 0x131   :  { %632 = vsyncadd [#allocation12], 4294966272 }
 0x132   :  { %389 = vsyncpa [#allocation3], 1 }
 0x133   :  { %390 = vsyncpa [#allocation6], 1 }
 0x134   :  { %391 = vsyncpa [#allocation9], 1 }
 0x135   :  { %392 = vsyncpa [#allocation4], 1 }
 0x136   :  { %393 = vsyncpa [#allocation12], 1 }

</bundles_post_ra>
